<compile_context>
chip_gen: v7x
topology: tpu7x:2x2x1
jax: 0.10.0
libtpu: 0.0.40
codegen_flags: <defaults>
</compile_context>

<pallas_src>
import jax
import jax.numpy as jnp
from jax.experimental import pallas as pl
from jax.experimental.pallas import tpu as pltpu


def _round_up(n, m):
    return ((n + m - 1) // m) * m


def _cdiv(a, b):
    return (a + b - 1) // b


def dqn_kernel(x_ref, w1_ref, b1_ref, w2_ref, b2_ref, w3_ref, b3_ref, o_ref):
    # fc1 + ReLU — MXU matmul with f32 accumulation; bias-add / ReLU in f32.
    h1 = jnp.dot(x_ref[...], w1_ref[...], preferred_element_type=jnp.float32)
    h1 = jnp.maximum(h1 + b1_ref[...], 0.0)
    # fc2 + ReLU
    h2 = jnp.dot(h1.astype(w2_ref.dtype), w2_ref[...],
                 preferred_element_type=jnp.float32)
    h2 = jnp.maximum(h2 + b2_ref[...], 0.0)
    # fc3 (no activation)
    o_ref[...] = (
        jnp.dot(h2.astype(w3_ref.dtype), w3_ref[...],
                preferred_element_type=jnp.float32)
        + b3_ref[...]
    ).astype(o_ref.dtype)


def prepare_params(params, compute_dtype=jnp.bfloat16):
    """Cast weight matrices to the MXU compute dtype ONCE (biases stay f32).

    Call at init / after optimizer steps, not per forward call.
    """
    w1, b1, w2, b2, w3, b3 = params
    return (w1.astype(compute_dtype), b1.astype(jnp.float32),
            w2.astype(compute_dtype), b2.astype(jnp.float32),
            w3.astype(compute_dtype), b3.astype(jnp.float32))


def dqn_forward(x, params, *, max_tb=1024):
    """x: [batch, input_dim]. params: (w1,b1,w2,b2,w3,b3) with W as [in, out]."""
    w1, b1, w2, b2, w3, b3 = params
    batch, in_dim = x.shape
    hidden = w1.shape[1]
    out_dim = w3.shape[1]
    compute_dtype = w1.dtype

    # --- Batch tiling: balanced tiles; >= 2 grid steps when batch allows so the
    # "parallel" axis really splits across the two v7x TensorCores.
    b8 = _round_up(batch, 8)
    n_tiles = _cdiv(b8, max_tb)
    if n_tiles < 2 and b8 >= 16:
        n_tiles = 2
    tb = _round_up(_cdiv(b8, n_tiles), 8)
    b_pad = _round_up(b8, tb)
    grid = (b_pad // tb,)

    # --- Input: cast to the compute dtype; pad only the batch rows (no K pad).
    xc = x.astype(compute_dtype)
    if b_pad != batch:
        xp = jnp.zeros((b_pad, in_dim), compute_dtype).at[:batch, :].set(xc)
    else:
        xp = xc

    resident = lambda i: (0, 0)  # weights/biases: same block every step -> stay in VMEM

    wbytes = jnp.dtype(compute_dtype).itemsize
    cost = pl.CostEstimate(
        flops=2 * b_pad * hidden * (in_dim + hidden + out_dim),
        transcendentals=0,
        bytes_accessed=(b_pad * in_dim * wbytes                  # x
                        + (in_dim + hidden) * hidden * wbytes    # w1, w2
                        + hidden * out_dim * wbytes              # w3
                        + (2 * hidden + out_dim) * 4             # biases (f32)
                        + b_pad * out_dim * 4),                  # output (f32)
    )

    out_padded = pl.pallas_call(
        dqn_kernel,
        out_shape=jax.ShapeDtypeStruct((b_pad, out_dim), jnp.float32),
        grid=grid,
        in_specs=[
            pl.BlockSpec((tb, in_dim), lambda i: (i, 0)),   # x tile (pipelined)
            pl.BlockSpec((in_dim, hidden), resident),        # w1
            pl.BlockSpec((1, hidden), resident),              # b1
            pl.BlockSpec((hidden, hidden), resident),          # w2
            pl.BlockSpec((1, hidden), resident),               # b2
            pl.BlockSpec((hidden, out_dim), resident),         # w3
            pl.BlockSpec((1, out_dim), resident),              # b3
        ],
        out_specs=pl.BlockSpec((tb, out_dim), lambda i: (i, 0)),
        compiler_params=pltpu.CompilerParams(
            dimension_semantics=("parallel",),   # shard batch tiles across TCs on v7x
            vmem_limit_bytes=32 * 1024 * 1024,   # tiny usage; explicit, safe everywhere
        ),
        cost_estimate=cost,
    )(xp, w1, b1, w2, b2, w3, b3)

    return out_padded[:batch] if b_pad != batch else out_padded


def init_params(key, input_dim, output_dim, hidden=128):
    # Deterministic init mimicking PyTorch's U(-1/sqrt(fan_in), 1/sqrt(fan_in)).
    ks = jax.random.split(key, 6)

    def lin(kw, kb, fan_in, fan_out):
        bound = 1.0 / jnp.sqrt(fan_in)
        w = jax.random.uniform(kw, (fan_in, fan_out), jnp.float32, -bound, bound)
        b = jax.random.uniform(kb, (1, fan_out), jnp.float32, -bound, bound)
        return w, b

    w1, b1 = lin(ks[0], ks[1], input_dim, hidden)
    w2, b2 = lin(ks[2], ks[3], hidden, hidden)
    w3, b3 = lin(ks[4], ks[5], hidden, output_dim)
    return (w1, b1, w2, b2, w3, b3)


def dqn_reference(x, params):
    w1, b1, w2, b2, w3, b3 = params
    h1 = jnp.maximum(x @ w1 + b1, 0.0)
    h2 = jnp.maximum(h1 @ w2 + b2, 0.0)
    return h2 @ w3 + b3


if __name__ == "__main__":
    key = jax.random.PRNGKey(0)
    kx, kp = jax.random.split(key)

    # Small DQN-style shapes (RAM-ish state, 4 actions).
    batch, input_dim, output_dim = 2, 8, 4
    x = jax.random.normal(kx, (batch, input_dim), jnp.float32)
    params_f32 = init_params(kp, input_dim, output_dim)
    params = prepare_params(params_f32)   # bf16 weights (cast once), f32 biases

    out = dqn_forward(x, params)
    out = jax.block_until_ready(out)

    ref = dqn_reference(x, params_f32)
    assert out.shape == (batch, output_dim)
    # bf16 matmul inputs vs. f32 reference -> loosened tolerance.
    assert jnp.allclose(out, ref, atol=3e-2, rtol=3e-2), jnp.abs(out - ref).max()

    print("KERNEL_OK")
</pallas_src>

<mosaic_0001>
module attributes {stable_mosaic.version = 11 : i64} {
  func.func @dqn_kernel(%arg0: i32, %arg1: memref<8x8xbf16, #tpu.memory_space<vmem>>, %arg2: memref<8x128xbf16, #tpu.memory_space<vmem>>, %arg3: memref<1x128xf32, #tpu.memory_space<vmem>>, %arg4: memref<128x128xbf16, #tpu.memory_space<vmem>>, %arg5: memref<1x128xf32, #tpu.memory_space<vmem>>, %arg6: memref<128x4xbf16, #tpu.memory_space<vmem>>, %arg7: memref<1x4xf32, #tpu.memory_space<vmem>>, %arg8: memref<8x4xf32, #tpu.memory_space<vmem>>) attributes {dimension_semantics = [#tpu.dimension_semantics<parallel>], iteration_bounds = array<i64: 1>, scalar_prefetch = 0 : i64, scratch_operands = 0 : i64, tpu.core_type = #tpu.core_type<tc>, window_params = [{transform_indices = @transform_0, window_bounds = array<i64: 8, 8>}, {pipeline_mode = #tpu.pipeline_mode<synchronous>, transform_indices = @transform_1, window_bounds = array<i64: 8, 128>}, {pipeline_mode = #tpu.pipeline_mode<synchronous>, transform_indices = @transform_2, window_bounds = array<i64: 1, 128>}, {pipeline_mode = #tpu.pipeline_mode<synchronous>, transform_indices = @transform_3, window_bounds = array<i64: 128, 128>}, {pipeline_mode = #tpu.pipeline_mode<synchronous>, transform_indices = @transform_4, window_bounds = array<i64: 1, 128>}, {pipeline_mode = #tpu.pipeline_mode<synchronous>, transform_indices = @transform_5, window_bounds = array<i64: 128, 4>}, {pipeline_mode = #tpu.pipeline_mode<synchronous>, transform_indices = @transform_6, window_bounds = array<i64: 1, 4>}, {transform_indices = @transform_7, window_bounds = array<i64: 8, 4>}]} {
    %c0 = arith.constant 0 : index
    %c0_0 = arith.constant 0 : index
    %0 = vector.load %arg1[%c0, %c0_0] : memref<8x8xbf16, #tpu.memory_space<vmem>>, vector<8x8xbf16>
    %c0_1 = arith.constant 0 : index
    %c0_2 = arith.constant 0 : index
    %1 = vector.load %arg2[%c0_1, %c0_2] : memref<8x128xbf16, #tpu.memory_space<vmem>>, vector<8x128xbf16>
    %cst = arith.constant dense<0.000000e+00> : vector<8x128xf32>
    %2 = tpu.matmul %0, %1, %cst {dimension_numbers = #tpu.dot_dimension_numbers<[1], [0], [0], [1], [0, 0, 1, 1], [], []>} : vector<8x8xbf16>, vector<8x128xbf16>, vector<8x128xf32> -> vector<8x128xf32>
    %c0_3 = arith.constant 0 : index
    %c0_4 = arith.constant 0 : index
    %3 = vector.load %arg3[%c0_3, %c0_4] : memref<1x128xf32, #tpu.memory_space<vmem>>, vector<1x128xf32>
    %4 = vector.broadcast %3 : vector<1x128xf32> to vector<8x128xf32>
    %5 = arith.addf %2, %4 : vector<8x128xf32>
    %cst_5 = arith.constant 0.000000e+00 : f32
    %6 = vector.broadcast %cst_5 : f32 to vector<8x128xf32>
    %7 = arith.maximumf %5, %6 : vector<8x128xf32>
    %8 = arith.truncf %7 : vector<8x128xf32> to vector<8x128xbf16>
    %c0_6 = arith.constant 0 : index
    %c0_7 = arith.constant 0 : index
    %9 = vector.load %arg4[%c0_6, %c0_7] : memref<128x128xbf16, #tpu.memory_space<vmem>>, vector<128x128xbf16>
    %cst_8 = arith.constant dense<0.000000e+00> : vector<8x128xf32>
    %10 = tpu.matmul %8, %9, %cst_8 {dimension_numbers = #tpu.dot_dimension_numbers<[1], [0], [0], [1], [0, 0, 1, 1], [], []>} : vector<8x128xbf16>, vector<128x128xbf16>, vector<8x128xf32> -> vector<8x128xf32>
    %c0_9 = arith.constant 0 : index
    %c0_10 = arith.constant 0 : index
    %11 = vector.load %arg5[%c0_9, %c0_10] : memref<1x128xf32, #tpu.memory_space<vmem>>, vector<1x128xf32>
    %12 = vector.broadcast %11 : vector<1x128xf32> to vector<8x128xf32>
    %13 = arith.addf %10, %12 : vector<8x128xf32>
    %cst_11 = arith.constant 0.000000e+00 : f32
    %14 = vector.broadcast %cst_11 : f32 to vector<8x128xf32>
    %15 = arith.maximumf %13, %14 : vector<8x128xf32>
    %16 = arith.truncf %15 : vector<8x128xf32> to vector<8x128xbf16>
    %c0_12 = arith.constant 0 : index
    %c0_13 = arith.constant 0 : index
    %17 = vector.load %arg6[%c0_12, %c0_13] : memref<128x4xbf16, #tpu.memory_space<vmem>>, vector<128x4xbf16>
    %cst_14 = arith.constant dense<0.000000e+00> : vector<8x4xf32>
    %18 = tpu.matmul %16, %17, %cst_14 {dimension_numbers = #tpu.dot_dimension_numbers<[1], [0], [0], [1], [0, 0, 1, 1], [], []>} : vector<8x128xbf16>, vector<128x4xbf16>, vector<8x4xf32> -> vector<8x4xf32>
    %c0_15 = arith.constant 0 : index
    %c0_16 = arith.constant 0 : index
    %19 = vector.load %arg7[%c0_15, %c0_16] : memref<1x4xf32, #tpu.memory_space<vmem>>, vector<1x4xf32>
    %20 = vector.broadcast %19 : vector<1x4xf32> to vector<8x4xf32>
    %21 = arith.addf %18, %20 : vector<8x4xf32>
    %c0_17 = arith.constant 0 : index
    %c0_18 = arith.constant 0 : index
    %22 = vector.load %arg8[%c0_17, %c0_18] : memref<8x4xf32, #tpu.memory_space<vmem>>, vector<8x4xf32>
    tpu.vector_store %arg8[%c0_17, %c0_18], %21 {strides = array<i32>} : memref<8x4xf32, #tpu.memory_space<vmem>>, vector<8x4xf32>,
    return
  }
  func.func @transform_0(%arg0: i32) -> (i32, i32) {
    %c0_i32 = arith.constant 0 : i32
    %c0_i32_0 = arith.constant 0 : i32
    return %arg0, %c0_i32 : i32, i32
  }
  func.func @transform_1(%arg0: i32) -> (i32, i32) {
    %c0_i32 = arith.constant 0 : i32
    %c0_i32_0 = arith.constant 0 : i32
    %c0_i32_1 = arith.constant 0 : i32
    return %c0_i32, %c0_i32_0 : i32, i32
  }
  func.func @transform_2(%arg0: i32) -> (i32, i32) {
    %c0_i32 = arith.constant 0 : i32
    %c0_i32_0 = arith.constant 0 : i32
    %c0_i32_1 = arith.constant 0 : i32
    return %c0_i32, %c0_i32_0 : i32, i32
  }
  func.func @transform_3(%arg0: i32) -> (i32, i32) {
    %c0_i32 = arith.constant 0 : i32
    %c0_i32_0 = arith.constant 0 : i32
    %c0_i32_1 = arith.constant 0 : i32
    return %c0_i32, %c0_i32_0 : i32, i32
  }
  func.func @transform_4(%arg0: i32) -> (i32, i32) {
    %c0_i32 = arith.constant 0 : i32
    %c0_i32_0 = arith.constant 0 : i32
    %c0_i32_1 = arith.constant 0 : i32
    return %c0_i32, %c0_i32_0 : i32, i32
  }
  func.func @transform_5(%arg0: i32) -> (i32, i32) {
    %c0_i32 = arith.constant 0 : i32
    %c0_i32_0 = arith.constant 0 : i32
    %c0_i32_1 = arith.constant 0 : i32
    return %c0_i32, %c0_i32_0 : i32, i32
  }
  func.func @transform_6(%arg0: i32) -> (i32, i32) {
    %c0_i32 = arith.constant 0 : i32
    %c0_i32_0 = arith.constant 0 : i32
    %c0_i32_1 = arith.constant 0 : i32
    return %c0_i32, %c0_i32_0 : i32, i32
  }
  func.func @transform_7(%arg0: i32) -> (i32, i32) {
    %c0_i32 = arith.constant 0 : i32
    %c0_i32_0 = arith.constant 0 : i32
    return %arg0, %c0_i32 : i32, i32
  }
}

</mosaic_0001>

<bundles_post_ra>
// kernel: tpu_custom_call.1
= control target key start
LH: loop header
LB: loop body
LE: loop exit
PB: predicated region body
PF: predicated region fallthrough
CT: control target
= control target key end

     0   :  { %vm40_vm0 = vcmask 1043456   ;;  %v420_v0 = vmov 0.0   ;;  %vm421_vm1 = vmmov 0   ;;  %vm36_vm2 = vcmask 64512   ;;  %s548_s1 = inlined_call_operand.vmem [shape: bf16[8,128], index: 1, kind: input, shape index: {}]   ;;  %s549_s0 = inlined_call_operand.vmem [shape: bf16[8,8], index: 0, kind: input, shape index: {}]   ;;  %s550_s3 = inlined_call_operand.vmem [shape: bf16[128,128], index: 3, kind: input, shape index: {}]   ;;  %s551_s5 = inlined_call_operand.vmem [shape: bf16[128,4], index: 5, kind: input, shape index: {}]   ;;  %s552_s2 = inlined_call_operand.vmem [shape: f32[1,128], index: 2, kind: input, shape index: {}]   ;;  %s553_s4 = inlined_call_operand.vmem [shape: f32[1,128], index: 4, kind: input, shape index: {}]   ;;  %s554_s6 = inlined_call_operand.vmem [shape: f32[1,4], index: 6, kind: input, shape index: {}]   ;;  %s555_s7 = inlined_call_operand.vmem [shape: f32[8,4], index: 7, kind: output, shape index: {}]  }
   0x1   :  { %356 = vmatprep.subr.bf16.mxu0 %v420_v0  ;;  %v28_v1 = vld [vmem:[%s548_s1] sm:$0xf]  ;;  %358 = vmatprep.mubr.msk.bf16.mxu0 %vm421_vm1, %v420_v0  ;;  %v405_v5 = vld [vmem:[%s550_s3 + $0x8] sm:$0xff]   ;;  %v406_v6 = vld [vmem:[%s550_s3 + $0x10] sm:$0xff]   ;;  %vm310_vm3 = vcmask 31744  }
   0x2   :  { %v42_v2 = vsel %vm40_vm0, %v28_v1, 0  ;;  %362 = vmatprep.subr.bf16.mxu1 %v420_v0  ;;  %v404_v3 = vld [vmem:[%s550_s3] sm:$0xff]   ;;  %378 = vmatprep.mubr.msk.bf16.mxu1 %vm421_vm1, %v420_v0  ;;  %v407_v7 = vld [vmem:[%s550_s3 + $0x18] sm:$0xff]   ;;  %v409_v9 = vld [vmem:[%s550_s3 + $0x28] sm:$0xff]  }
   0x3   :  { %357 = vmatpush3.bf16.msra.mxu0 %v42_v2  ;;  %v27_v4 = vld [vmem:[%s549_s0] sm:$0xf]  ;;  %363 = vmatpush3.bf16.msra.mxu1 %v404_v3  ;;  %v410_v10 = vld [vmem:[%s550_s3 + $0x30] sm:$0xff]   ;;  %v411_v11 = vld [vmem:[%s550_s3 + $0x38] sm:$0xff]  }
   0x4   :  { %382 = vmatprep.subr.bf16.mxu0 %v420_v0  ;;  %364 = vmatprep.subr.bf16.mxu1 %v420_v0  ;;  %v408_v8 = vld [vmem:[%s550_s3 + $0x20] sm:$0xff]   ;;  %v413_v13 = vld [vmem:[%s551_s5 + $0x8] sm:$0xff]   ;;  %v414_v14 = vld [vmem:[%s551_s5 + $0x10] sm:$0xff]  }
   0x5   :  { %v412_v12 = vld [vmem:[%s551_s5] sm:$0xff]   ;;  %v415_v15 = vld [vmem:[%s551_s5 + $0x18] sm:$0xff]   ;;  %v417_v17 = vld [vmem:[%s551_s5 + $0x28] sm:$0xff]  }
   0x6   :  { %359 = vmatmul.mubr.msk.bf16.vlgmr.msra.gmra.mrb[0].mxu0 %vm36_vm2, %v27_v4  ;;  %v416_v16 = vld [vmem:[%s551_s5 + $0x20] sm:$0xff]   ;;  %v418_v26 = vld [vmem:[%s551_s5 + $0x30] sm:$0xff]   ;;  %v419_v27 = vld [vmem:[%s551_s5 + $0x38] sm:$0xff]  }
   0x7   :  { %398 = vmatprep.mubr.msk.bf16.mxu0 %vm421_vm1, %v420_v0  ;;  %365 = vmatpush3.bf16.msra.mxu1 %v405_v5  ;;  %v316_v18 = vld [vmem:[%s552_s2] ss:$0 sm:$0xff] }
   0x8   :  { %366 = vmatprep.subr.bf16.mxu1 %v420_v0  ;;  %383 = vmatpush3.bf16.msra.mxu0 %v412_v12  ;;  %v318_v28 = vld [vmem:[%s553_s4] ss:$0 sm:$0xff] }
   0x9   :  { %384 = vmatprep.subr.bf16.mxu0 %v420_v0  ;;  %v327_v36 = vld [vmem:[%s554_s6] ss:$0 sm:$0xff] }
   0xb   :  { %367 = vmatpush3.bf16.msra.mxu1 %v406_v6 }
   0xc   :  { %368 = vmatprep.subr.bf16.mxu1 %v420_v0  ;;  %385 = vmatpush3.bf16.msra.mxu0 %v413_v13 }
   0xd   :  { %386 = vmatprep.subr.bf16.mxu0 %v420_v0 }
   0xf   :  { %369 = vmatpush3.bf16.msra.mxu1 %v407_v7 }
  0x10   :  { %370 = vmatprep.subr.bf16.mxu1 %v420_v0  ;;  %387 = vmatpush3.bf16.msra.mxu0 %v414_v14 }
  0x11   :  { %388 = vmatprep.subr.bf16.mxu0 %v420_v0 }
  0x13   :  { %371 = vmatpush3.bf16.msra.mxu1 %v408_v8 }
  0x14   :  { %372 = vmatprep.subr.bf16.mxu1 %v420_v0  ;;  %389 = vmatpush3.bf16.msra.mxu0 %v415_v15 }
  0x15   :  { %390 = vmatprep.subr.bf16.mxu0 %v420_v0 }
  0x17   :  { %373 = vmatpush3.bf16.msra.mxu1 %v409_v9 }
  0x18   :  { %374 = vmatprep.subr.bf16.mxu1 %v420_v0  ;;  %391 = vmatpush3.bf16.msra.mxu0 %v416_v16 }
  0x19   :  { %392 = vmatprep.subr.bf16.mxu0 %v420_v0 }
  0x1b   :  { %375 = vmatpush3.bf16.msra.mxu1 %v410_v10 }
  0x1c   :  { %376 = vmatprep.subr.bf16.mxu1 %v420_v0  ;;  %393 = vmatpush3.bf16.msra.mxu0 %v417_v17 }
  0x1d   :  { %394 = vmatprep.subr.bf16.mxu0 %v420_v0 }
  0x1f   :  { %377 = vmatpush3.bf16.msra.mxu1 %v411_v11 }
  0x20   :  { %395 = vmatpush3.bf16.msra.mxu0 %v418_v26 }
  0x21   :  { %396 = vmatprep.subr.bf16.mxu0 %v420_v0 }
  0x24   :  { %397 = vmatpush3.bf16.msra.mxu0 %v419_v27 }
  0xd9   :  { %v78_v19 = vpop.f32.mrb[0].mxu0 }
  0xda   :  { %v79_v20 = vadd.f32 %v316_v18, %v78_v19  ;;  %v360_v21 = vpop.f32.mrb[1].mxu0 }
  0xdb   :  { %v81_v22 = vpop.f32.mrb[2].mxu0 }
  0xdc   :  { %v84_v23 = vmax.f32 %v79_v20, 0.0  ;;  %v361_v24 = vpop.f32.mrb[3].mxu0 }
  0xde   :  { %v85_v25 = vpack.c.bf16 %v84_v23, %v84_v23 }
  0xe0   :  { %379 = vmatmul.mubr.bf16.vlgmr.msra.gmra.mrb[0].mxu1 %v85_v25 }
 0x1b3   :  { %v191_v29 = vpop.f32.mrb[0].mxu1 }
 0x1b4   :  { %v192_v30 = vadd.f32 %v318_v28, %v191_v29  ;;  %v380_v31 = vpop.f32.mrb[1].mxu1 }
 0x1b5   :  { %v194_v32 = vpop.f32.mrb[2].mxu1 }
 0x1b6   :  { %v197_v33 = vmax.f32 %v192_v30, 0.0  ;;  %v381_v34 = vpop.f32.mrb[3].mxu1 }
 0x1b8   :  { %v198_v35 = vpack.c.bf16 %v197_v33, %v197_v33 }
 0x1ba   :  { %399 = vmatmul.mubr.bf16.vlgmr.msra.gmra.mrb[4].mxu0 %v198_v35 }
 0x28d   :  { %v304_v37 = vpop.f32.mrb[4].mxu0 }
 0x28e   :  { %v305_v38 = vadd.f32 %v327_v36, %v304_v37  ;;  %v400_v39 = vpop.f32.mrb[5].mxu0 }
 0x28f   :  { %v307_v40 = vpop.f32.mrb[6].mxu0 }
 0x290   :  { %311 = vst.msk [vmem:[%s555_s7] sm:$0xff] %vm310_vm3, %v305_v38  ;;  %v401_v41 = vpop.f32.mrb[7].mxu0 }

</bundles_post_ra>
